<compile_context>
chip_gen: v7x
topology: tpu7x:2x2x1
jax: 0.10.0
libtpu: 0.0.40
codegen_flags: <defaults>
</compile_context>

<pallas_src>
import functools

import jax
import jax.numpy as jnp
from jax.experimental import pallas as pl
from jax.experimental.pallas import tpu as pltpu

BN_EPS = 1e-5
LANE = 128


def _round_up(x, m):
    return ((x + m - 1) // m) * m


def _mlp_kernel(x_ref, w1_ref, b1_ref, w2_ref, b2_ref, w3_ref, b3_ref, out_ref):
    """out = relu(relu(x @ W1' + b1') @ W2' + b2') @ W3p + b3p   (BN pre-folded)."""
    x = x_ref[...].astype(w1_ref.dtype)                                   # (TB, D) bf16

    h1 = jnp.dot(x, w1_ref[...], preferred_element_type=jnp.float32) + b1_ref[...]
    h1 = jnp.maximum(h1, 0.0)                                             # (TB, H) f32

    h2 = jnp.dot(h1.astype(w2_ref.dtype), w2_ref[...],
                 preferred_element_type=jnp.float32) + b2_ref[...]
    h2 = jnp.maximum(h2, 0.0)                                             # (TB, H) f32

    out = jnp.dot(h2.astype(w3_ref.dtype), w3_ref[...],
                  preferred_element_type=jnp.float32) + b3_ref[...]       # (TB, Cp) f32
    out_ref[...] = out


def improved_attention_model(x, params, *, tb=None, weight_dtype=jnp.bfloat16):
    """Returns (logits, weighted_features, attention_weights) like the PyTorch model."""
    B, D = x.shape
    H = params["w1"].shape[1]
    C = params["w3"].shape[1]
    Cp = _round_up(C, LANE)                 # lane-dense logits tile

    # --- fold BatchNorm (eval) into fc1 / fc2 -------------------------------
    s1 = params["g1"] * jax.lax.rsqrt(params["v1"] + BN_EPS)              # (1, H)
    w1f = params["w1"] * s1                                               # (D, H)
    b1f = (params["b1"] - params["m1"]) * s1 + params["be1"]              # (1, H)

    s2 = params["g2"] * jax.lax.rsqrt(params["v2"] + BN_EPS)
    w2f = params["w2"] * s2                                               # (H, H)
    b2f = (params["b2"] - params["m2"]) * s2 + params["be2"]              # (1, H)

    # --- pad fc3 to a lane-dense (H, Cp) so the output store is unmasked ----
    w3p = jnp.zeros((H, Cp), jnp.float32).at[:, :C].set(params["w3"])
    b3p = jnp.zeros((1, Cp), jnp.float32).at[:, :C].set(params["b3"])

    # bf16 weights, f32 biases (added after f32 accumulation)
    w1q = w1f.astype(weight_dtype)
    w2q = w2f.astype(weight_dtype)
    w3q = w3p.astype(weight_dtype)

    # --- batch tiling --------------------------------------------------------
    if tb is None:
        # small batches: single whole-batch tile; large batches: 1024-row tiles
        # (comfortably inside v7x's 64 MiB VMEM / 32 MiB scoped default).
        tb = min(_round_up(B, 8), 1024)
    Bp = _round_up(B, tb)
    xp = x if Bp == B else jnp.pad(x, ((0, Bp - B), (0, 0)))

    grid = (Bp // tb,)
    batch_spec_in = pl.BlockSpec((tb, D), lambda i: (i, 0))
    resident = lambda shape: pl.BlockSpec(shape, lambda i: (0, 0))        # noqa: E731

    out_p = pl.pallas_call(
        _mlp_kernel,
        out_shape=jax.ShapeDtypeStruct((Bp, Cp), jnp.float32),
        grid=grid,
        in_specs=[
            batch_spec_in,            # x tile
            resident((D, H)),         # w1 (BN-folded, bf16)
            resident((1, H)),         # b1 (BN-folded, f32)
            resident((H, H)),         # w2
            resident((1, H)),         # b2
            resident((H, Cp)),        # w3 (lane-padded)
            resident((1, Cp)),        # b3 (lane-padded)
        ],
        out_specs=pl.BlockSpec((tb, Cp), lambda i: (i, 0)),
        compiler_params=pltpu.CompilerParams(
            dimension_semantics=("parallel",),
        ),
    )(xp, w1q, b1f, w2q, b2f, w3q, b3p)

    logits = out_p[:B, :C]

    # softmax over a size-1 axis is exactly 1.0 -> attention is a no-op:
    attention_weights = jnp.ones((B, 1), jnp.float32)
    weighted_features = x                                  # x * 1.0 == x (exact)
    return logits, weighted_features, attention_weights


def init_params(key, input_dim, attention_dim, hidden_dim, num_classes):
    ks = jax.random.split(key, 8)

    def lin(k, fan_in, fan_out):
        bound = 1.0 / jnp.sqrt(fan_in)
        kw, kb = jax.random.split(k)
        w = jax.random.uniform(kw, (fan_in, fan_out), jnp.float32, -bound, bound)
        b = jax.random.uniform(kb, (1, fan_out), jnp.float32, -bound, bound)
        return w, b

    watt, batt = lin(ks[0], input_dim, attention_dim)
    wctx, _ = lin(ks[1], attention_dim, 1)          # context Linear has no bias
    w1, b1 = lin(ks[2], input_dim, hidden_dim)
    w2, b2 = lin(ks[3], hidden_dim, hidden_dim)
    w3, b3 = lin(ks[4], hidden_dim, num_classes)

    ones_h = jnp.ones((1, hidden_dim), jnp.float32)
    zeros_h = jnp.zeros((1, hidden_dim), jnp.float32)

    return dict(
        # attention params kept for interface fidelity (provably unused:
        # softmax over the size-1 dim makes the branch an exact no-op).
        watt=watt, batt=batt, wctx=wctx,
        w1=w1, b1=b1, g1=ones_h, be1=zeros_h, m1=zeros_h, v1=ones_h,
        w2=w2, b2=b2, g2=ones_h, be2=zeros_h, m2=zeros_h, v2=ones_h,
        w3=w3, b3=b3,
    )


def _reference(x, p):
    """Full-fidelity f32 reference including the (degenerate) attention branch."""
    att = jnp.maximum(x @ p["watt"] + p["batt"], 0.0)
    s = att @ p["wctx"]
    aw = jax.nn.softmax(s, axis=1)
    wf = x * aw
    h1 = wf @ p["w1"] + p["b1"]
    h1 = jnp.maximum((h1 - p["m1"]) / jnp.sqrt(p["v1"] + BN_EPS) * p["g1"] + p["be1"], 0.0)
    h2 = h1 @ p["w2"] + p["b2"]
    h2 = jnp.maximum((h2 - p["m2"]) / jnp.sqrt(p["v2"] + BN_EPS) * p["g2"] + p["be2"], 0.0)
    return h2 @ p["w3"] + p["b3"], wf, aw


if __name__ == "__main__":
    batch, input_dim, attention_dim, hidden_dim, num_classes = 8, 16, 64, 128, 2

    key = jax.random.PRNGKey(0)
    kx, kp = jax.random.split(key)
    x = jax.random.normal(kx, (batch, input_dim), jnp.float32)
    params = init_params(kp, input_dim, attention_dim, hidden_dim, num_classes)

    fwd = jax.jit(functools.partial(improved_attention_model))
    out, wf, aw = fwd(x, params)
    jax.block_until_ready((out, wf, aw))

    r_out, r_wf, r_aw = _reference(x, params)
    # logits: bf16 weights with f32 accumulation -> relaxed tolerance
    assert jnp.allclose(out, r_out, atol=5e-2, rtol=5e-2), "logits mismatch"
    # attention branch outputs are exact (degenerate softmax)
    assert jnp.allclose(wf, r_wf, atol=1e-6, rtol=1e-6), "weighted_features mismatch"
    assert jnp.allclose(aw, r_aw, atol=1e-6, rtol=1e-6), "attention_weights mismatch"

    print("KERNEL_OK")
</pallas_src>

<mosaic_0001>
module attributes {stable_mosaic.version = 11 : i64} {
  func.func @_mlp_kernel(%arg0: i32, %arg1: memref<8x16xf32, #tpu.memory_space<vmem>>, %arg2: memref<16x128xbf16, #tpu.memory_space<vmem>>, %arg3: memref<1x128xf32, #tpu.memory_space<vmem>>, %arg4: memref<128x128xbf16, #tpu.memory_space<vmem>>, %arg5: memref<1x128xf32, #tpu.memory_space<vmem>>, %arg6: memref<128x128xbf16, #tpu.memory_space<vmem>>, %arg7: memref<1x128xf32, #tpu.memory_space<vmem>>, %arg8: memref<8x128xf32, #tpu.memory_space<vmem>>) attributes {dimension_semantics = [#tpu.dimension_semantics<parallel>], iteration_bounds = array<i64: 1>, scalar_prefetch = 0 : i64, scratch_operands = 0 : i64, tpu.core_type = #tpu.core_type<tc>, window_params = [{transform_indices = @transform_0, window_bounds = array<i64: 8, 16>}, {pipeline_mode = #tpu.pipeline_mode<synchronous>, transform_indices = @transform_1, window_bounds = array<i64: 16, 128>}, {pipeline_mode = #tpu.pipeline_mode<synchronous>, transform_indices = @transform_2, window_bounds = array<i64: 1, 128>}, {pipeline_mode = #tpu.pipeline_mode<synchronous>, transform_indices = @transform_3, window_bounds = array<i64: 128, 128>}, {pipeline_mode = #tpu.pipeline_mode<synchronous>, transform_indices = @transform_4, window_bounds = array<i64: 1, 128>}, {pipeline_mode = #tpu.pipeline_mode<synchronous>, transform_indices = @transform_5, window_bounds = array<i64: 128, 128>}, {pipeline_mode = #tpu.pipeline_mode<synchronous>, transform_indices = @transform_6, window_bounds = array<i64: 1, 128>}, {transform_indices = @transform_7, window_bounds = array<i64: 8, 128>}]} {
    %c0 = arith.constant 0 : index
    %c0_0 = arith.constant 0 : index
    %0 = vector.load %arg1[%c0, %c0_0] : memref<8x16xf32, #tpu.memory_space<vmem>>, vector<8x16xf32>
    %1 = arith.truncf %0 : vector<8x16xf32> to vector<8x16xbf16>
    %c0_1 = arith.constant 0 : index
    %c0_2 = arith.constant 0 : index
    %2 = vector.load %arg2[%c0_1, %c0_2] : memref<16x128xbf16, #tpu.memory_space<vmem>>, vector<16x128xbf16>
    %cst = arith.constant dense<0.000000e+00> : vector<8x128xf32>
    %3 = tpu.matmul %1, %2, %cst {dimension_numbers = #tpu.dot_dimension_numbers<[1], [0], [0], [1], [0, 0, 1, 1], [], []>} : vector<8x16xbf16>, vector<16x128xbf16>, vector<8x128xf32> -> vector<8x128xf32>
    %c0_3 = arith.constant 0 : index
    %c0_4 = arith.constant 0 : index
    %4 = vector.load %arg3[%c0_3, %c0_4] : memref<1x128xf32, #tpu.memory_space<vmem>>, vector<1x128xf32>
    %5 = vector.broadcast %4 : vector<1x128xf32> to vector<8x128xf32>
    %6 = arith.addf %3, %5 : vector<8x128xf32>
    %cst_5 = arith.constant 0.000000e+00 : f32
    %7 = vector.broadcast %cst_5 : f32 to vector<8x128xf32>
    %8 = arith.maximumf %6, %7 : vector<8x128xf32>
    %9 = arith.truncf %8 : vector<8x128xf32> to vector<8x128xbf16>
    %c0_6 = arith.constant 0 : index
    %c0_7 = arith.constant 0 : index
    %10 = vector.load %arg4[%c0_6, %c0_7] : memref<128x128xbf16, #tpu.memory_space<vmem>>, vector<128x128xbf16>
    %cst_8 = arith.constant dense<0.000000e+00> : vector<8x128xf32>
    %11 = tpu.matmul %9, %10, %cst_8 {dimension_numbers = #tpu.dot_dimension_numbers<[1], [0], [0], [1], [0, 0, 1, 1], [], []>} : vector<8x128xbf16>, vector<128x128xbf16>, vector<8x128xf32> -> vector<8x128xf32>
    %c0_9 = arith.constant 0 : index
    %c0_10 = arith.constant 0 : index
    %12 = vector.load %arg5[%c0_9, %c0_10] : memref<1x128xf32, #tpu.memory_space<vmem>>, vector<1x128xf32>
    %13 = vector.broadcast %12 : vector<1x128xf32> to vector<8x128xf32>
    %14 = arith.addf %11, %13 : vector<8x128xf32>
    %cst_11 = arith.constant 0.000000e+00 : f32
    %15 = vector.broadcast %cst_11 : f32 to vector<8x128xf32>
    %16 = arith.maximumf %14, %15 : vector<8x128xf32>
    %17 = arith.truncf %16 : vector<8x128xf32> to vector<8x128xbf16>
    %c0_12 = arith.constant 0 : index
    %c0_13 = arith.constant 0 : index
    %18 = vector.load %arg6[%c0_12, %c0_13] : memref<128x128xbf16, #tpu.memory_space<vmem>>, vector<128x128xbf16>
    %cst_14 = arith.constant dense<0.000000e+00> : vector<8x128xf32>
    %19 = tpu.matmul %17, %18, %cst_14 {dimension_numbers = #tpu.dot_dimension_numbers<[1], [0], [0], [1], [0, 0, 1, 1], [], []>} : vector<8x128xbf16>, vector<128x128xbf16>, vector<8x128xf32> -> vector<8x128xf32>
    %c0_15 = arith.constant 0 : index
    %c0_16 = arith.constant 0 : index
    %20 = vector.load %arg7[%c0_15, %c0_16] : memref<1x128xf32, #tpu.memory_space<vmem>>, vector<1x128xf32>
    %21 = vector.broadcast %20 : vector<1x128xf32> to vector<8x128xf32>
    %22 = arith.addf %19, %21 : vector<8x128xf32>
    %c0_17 = arith.constant 0 : index
    %c0_18 = arith.constant 0 : index
    %23 = vector.load %arg8[%c0_17, %c0_18] : memref<8x128xf32, #tpu.memory_space<vmem>>, vector<8x128xf32>
    tpu.vector_store %arg8[%c0_17, %c0_18], %22 {strides = array<i32>} : memref<8x128xf32, #tpu.memory_space<vmem>>, vector<8x128xf32>,
    return
  }
  func.func @transform_0(%arg0: i32) -> (i32, i32) {
    %c0_i32 = arith.constant 0 : i32
    %c0_i32_0 = arith.constant 0 : i32
    return %arg0, %c0_i32 : i32, i32
  }
  func.func @transform_1(%arg0: i32) -> (i32, i32) {
    %c0_i32 = arith.constant 0 : i32
    %c0_i32_0 = arith.constant 0 : i32
    %c0_i32_1 = arith.constant 0 : i32
    return %c0_i32, %c0_i32_0 : i32, i32
  }
  func.func @transform_2(%arg0: i32) -> (i32, i32) {
    %c0_i32 = arith.constant 0 : i32
    %c0_i32_0 = arith.constant 0 : i32
    %c0_i32_1 = arith.constant 0 : i32
    return %c0_i32, %c0_i32_0 : i32, i32
  }
  func.func @transform_3(%arg0: i32) -> (i32, i32) {
    %c0_i32 = arith.constant 0 : i32
    %c0_i32_0 = arith.constant 0 : i32
    %c0_i32_1 = arith.constant 0 : i32
    return %c0_i32, %c0_i32_0 : i32, i32
  }
  func.func @transform_4(%arg0: i32) -> (i32, i32) {
    %c0_i32 = arith.constant 0 : i32
    %c0_i32_0 = arith.constant 0 : i32
    %c0_i32_1 = arith.constant 0 : i32
    return %c0_i32, %c0_i32_0 : i32, i32
  }
  func.func @transform_5(%arg0: i32) -> (i32, i32) {
    %c0_i32 = arith.constant 0 : i32
    %c0_i32_0 = arith.constant 0 : i32
    %c0_i32_1 = arith.constant 0 : i32
    return %c0_i32, %c0_i32_0 : i32, i32
  }
  func.func @transform_6(%arg0: i32) -> (i32, i32) {
    %c0_i32 = arith.constant 0 : i32
    %c0_i32_0 = arith.constant 0 : i32
    %c0_i32_1 = arith.constant 0 : i32
    return %c0_i32, %c0_i32_0 : i32, i32
  }
  func.func @transform_7(%arg0: i32) -> (i32, i32) {
    %c0_i32 = arith.constant 0 : i32
    %c0_i32_0 = arith.constant 0 : i32
    return %arg0, %c0_i32 : i32, i32
  }
}

</mosaic_0001>

<bundles_post_ra>
// kernel: improved_attention_model.1
= control target key start
LH: loop header
LB: loop body
LE: loop exit
PB: predicated region body
PF: predicated region fallthrough
CT: control target
= control target key end

     0   :  { %v425_v0 = vmov 0.0   ;;  %vm426_vm0 = vmmov 0   ;;  %vm44_vm1 = vcmask 130048   ;;  %s553_s1 = inlined_call_operand.vmem [shape: bf16[16,128], index: 1, kind: input, shape index: {}]   ;;  %s554_s0 = inlined_call_operand.vmem [shape: f32[8,16], index: 0, kind: input, shape index: {}]   ;;  %s555_s3 = inlined_call_operand.vmem [shape: bf16[128,128], index: 3, kind: input, shape index: {}]   ;;  %s556_s5 = inlined_call_operand.vmem [shape: bf16[128,128], index: 5, kind: input, shape index: {}]   ;;  %s557_s2 = inlined_call_operand.vmem [shape: f32[1,128], index: 2, kind: input, shape index: {}]   ;;  %s558_s4 = inlined_call_operand.vmem [shape: f32[1,128], index: 4, kind: input, shape index: {}]   ;;  %s559_s6 = inlined_call_operand.vmem [shape: f32[1,128], index: 6, kind: input, shape index: {}]   ;;  %s560_s7 = inlined_call_operand.vmem [shape: f32[8,128], index: 7, kind: output, shape index: {}]  }
   0x1   :  { %360 = vmatprep.subr.bf16.mxu0 %v425_v0  ;;  %v408_v1 = vld [vmem:[%s553_s1] sm:$0xff]   ;;  %362 = vmatprep.mubr.msk.bf16.mxu0 %vm426_vm0, %v425_v0  ;;  %v410_v5 = vld [vmem:[%s555_s3 + $0x8] sm:$0xff]   ;;  %v411_v6 = vld [vmem:[%s555_s3 + $0x10] sm:$0xff]  }
   0x2   :  { %v27_v2 = vld [vmem:[%s554_s0] sm:$0xff]  ;;  %366 = vmatprep.subr.bf16.mxu1 %v425_v0  ;;  %382 = vmatprep.mubr.msk.bf16.mxu1 %vm426_vm0, %v425_v0  ;;  %v412_v7 = vld [vmem:[%s555_s3 + $0x18] sm:$0xff]   ;;  %v414_v9 = vld [vmem:[%s555_s3 + $0x28] sm:$0xff]  }
   0x3   :  { %361 = vmatpush3.bf16.msra.mxu0 %v408_v1  ;;  %v28_v3 = vpack.c.bf16 %v27_v2, %v27_v2  ;;  %v409_v4 = vld [vmem:[%s555_s3] sm:$0xff]   ;;  %v415_v10 = vld [vmem:[%s555_s3 + $0x30] sm:$0xff]   ;;  %v416_v11 = vld [vmem:[%s555_s3 + $0x38] sm:$0xff]  }
   0x4   :  { %386 = vmatprep.subr.bf16.mxu0 %v425_v0  ;;  %367 = vmatpush3.bf16.msra.mxu1 %v409_v4  ;;  %v413_v8 = vld [vmem:[%s555_s3 + $0x20] sm:$0xff]   ;;  %v418_v13 = vld [vmem:[%s556_s5 + $0x8] sm:$0xff]   ;;  %v419_v14 = vld [vmem:[%s556_s5 + $0x10] sm:$0xff]  }
   0x5   :  { %368 = vmatprep.subr.bf16.mxu1 %v425_v0  ;;  %v417_v12 = vld [vmem:[%s556_s5] sm:$0xff]   ;;  %v420_v15 = vld [vmem:[%s556_s5 + $0x18] sm:$0xff]   ;;  %v422_v17 = vld [vmem:[%s556_s5 + $0x28] sm:$0xff]  }
   0x6   :  { %363 = vmatmul.mubr.msk.bf16.vlgmr.msra.gmra.mrb[0].mxu0 %vm44_vm1, %v28_v3  ;;  %v421_v16 = vld [vmem:[%s556_s5 + $0x20] sm:$0xff]   ;;  %v423_v26 = vld [vmem:[%s556_s5 + $0x30] sm:$0xff]   ;;  %v424_v27 = vld [vmem:[%s556_s5 + $0x38] sm:$0xff]  }
   0x7   :  { %402 = vmatprep.mubr.msk.bf16.mxu0 %vm426_vm0, %v425_v0  ;;  %387 = vmatpush3.bf16.msra.mxu0 %v417_v12  ;;  %v319_v18 = vld [vmem:[%s557_s2] ss:$0 sm:$0xff] }
   0x8   :  { %369 = vmatpush3.bf16.msra.mxu1 %v410_v5  ;;  %388 = vmatprep.subr.bf16.mxu0 %v425_v0  ;;  %v322_v28 = vld [vmem:[%s558_s4] ss:$0 sm:$0xff] }
   0x9   :  { %370 = vmatprep.subr.bf16.mxu1 %v425_v0  ;;  %v331_v36 = vld [vmem:[%s559_s6] ss:$0 sm:$0xff] }
   0xb   :  { %389 = vmatpush3.bf16.msra.mxu0 %v418_v13 }
   0xc   :  { %371 = vmatpush3.bf16.msra.mxu1 %v411_v6  ;;  %390 = vmatprep.subr.bf16.mxu0 %v425_v0 }
   0xd   :  { %372 = vmatprep.subr.bf16.mxu1 %v425_v0 }
   0xf   :  { %391 = vmatpush3.bf16.msra.mxu0 %v419_v14 }
  0x10   :  { %373 = vmatpush3.bf16.msra.mxu1 %v412_v7  ;;  %392 = vmatprep.subr.bf16.mxu0 %v425_v0 }
  0x11   :  { %374 = vmatprep.subr.bf16.mxu1 %v425_v0 }
  0x13   :  { %393 = vmatpush3.bf16.msra.mxu0 %v420_v15 }
  0x14   :  { %375 = vmatpush3.bf16.msra.mxu1 %v413_v8  ;;  %394 = vmatprep.subr.bf16.mxu0 %v425_v0 }
  0x15   :  { %376 = vmatprep.subr.bf16.mxu1 %v425_v0 }
  0x17   :  { %395 = vmatpush3.bf16.msra.mxu0 %v421_v16 }
  0x18   :  { %377 = vmatpush3.bf16.msra.mxu1 %v414_v9  ;;  %396 = vmatprep.subr.bf16.mxu0 %v425_v0 }
  0x19   :  { %378 = vmatprep.subr.bf16.mxu1 %v425_v0 }
  0x1b   :  { %397 = vmatpush3.bf16.msra.mxu0 %v422_v17 }
  0x1c   :  { %379 = vmatpush3.bf16.msra.mxu1 %v415_v10  ;;  %398 = vmatprep.subr.bf16.mxu0 %v425_v0 }
  0x1d   :  { %380 = vmatprep.subr.bf16.mxu1 %v425_v0 }
  0x1f   :  { %399 = vmatpush3.bf16.msra.mxu0 %v423_v26 }
  0x20   :  { %381 = vmatpush3.bf16.msra.mxu1 %v416_v11  ;;  %400 = vmatprep.subr.bf16.mxu0 %v425_v0 }
  0x23   :  { %401 = vmatpush3.bf16.msra.mxu0 %v424_v27 }
  0xd9   :  { %v82_v19 = vpop.f32.mrb[0].mxu0 }
  0xda   :  { %v83_v20 = vadd.f32 %v319_v18, %v82_v19  ;;  %v364_v21 = vpop.f32.mrb[1].mxu0 }
  0xdb   :  { %v85_v22 = vpop.f32.mrb[2].mxu0 }
  0xdc   :  { %v88_v23 = vmax.f32 %v83_v20, 0.0  ;;  %v365_v24 = vpop.f32.mrb[3].mxu0 }
  0xde   :  { %v89_v25 = vpack.c.bf16 %v88_v23, %v88_v23 }
  0xe0   :  { %383 = vmatmul.mubr.bf16.vlgmr.msra.gmra.mrb[0].mxu1 %v89_v25 }
 0x1b3   :  { %v195_v29 = vpop.f32.mrb[0].mxu1 }
 0x1b4   :  { %v196_v30 = vadd.f32 %v322_v28, %v195_v29  ;;  %v384_v31 = vpop.f32.mrb[1].mxu1 }
 0x1b5   :  { %v198_v32 = vpop.f32.mrb[2].mxu1 }
 0x1b6   :  { %v201_v33 = vmax.f32 %v196_v30, 0.0  ;;  %v385_v34 = vpop.f32.mrb[3].mxu1 }
 0x1b8   :  { %v202_v35 = vpack.c.bf16 %v201_v33, %v201_v33 }
 0x1ba   :  { %403 = vmatmul.mubr.bf16.vlgmr.msra.gmra.mrb[4].mxu0 %v202_v35 }
 0x28d   :  { %v308_v37 = vpop.f32.mrb[4].mxu0 }
 0x28e   :  { %v309_v38 = vadd.f32 %v331_v36, %v308_v37  ;;  %v404_v39 = vpop.f32.mrb[5].mxu0 }
 0x28f   :  { %v311_v40 = vpop.f32.mrb[6].mxu0 }
 0x290   :  { %314 = vst [vmem:[%s560_s7] sm:$0xff] %v309_v38  ;;  %v405_v41 = vpop.f32.mrb[7].mxu0 }

</bundles_post_ra>
